<compile_context>
chip_gen: v5e
topology: v5e:2x2
jax: 0.10.0
libtpu: 0.0.40
codegen_flags: <defaults>
</compile_context>

<pallas_src>
import jax
import jax.numpy as jnp
from jax.experimental import pallas as pl
from jax.experimental.pallas import tpu as pltpu


_BLOCK_FLOOR_BYTES = 2 * 1024 * 1024   # never shrink blocks below ~2 MiB


def _round_up(v: int, m: int) -> int:
    return ((v + m - 1) // m) * m


def _chip_config():
    """(block_bytes, vmem_limit_bytes, min_grid_steps), keyed off VMEM capacity."""
    vmem_cap = 128 << 20
    try:
        vmem_cap = int(pltpu.get_tpu_info().vmem_capacity_bytes)
    except Exception:
        pass  # fall back to the conservative 128 MiB assumption
    if vmem_cap <= (64 << 20):
        # v7x-class: 64 MiB VMEM per TC, 2 TCs/chip, ~3.2 TB/s HBM.
        # Bias toward the largest blocks that fit (per-step overhead is
        # relatively larger), but keep >=8 steps so both TCs stay fed.
        return (7 << 20), (44 << 20), 8
    # v5e / v6e: 128 MiB VMEM, single TC -> big blocks, few steps.
    return (12 << 20), (64 << 20), 4


def _clipped_relu_kernel(x_ref, o_ref):
    x = x_ref[...]
    dt = x.dtype
    if jnp.issubdtype(dt, jnp.integer):
        info = jnp.iinfo(dt)
        lo = jnp.asarray(max(0, info.min), dt)
        hi = jnp.asarray(min(255, info.max), dt)
    else:
        lo = jnp.asarray(0.0, dt)
        hi = jnp.asarray(255.0, dt)
    o_ref[...] = jnp.clip(x, lo, hi)


def clipped_relu(x: jax.Array, *, donate: bool = False) -> jax.Array:
    """Elementwise clamp(x, 0, 255); identical semantics to the PyTorch module."""
    orig_shape = x.shape
    if x.size == 0:
        return x

    dt = jnp.dtype(x.dtype)
    # Fast path: uint8 can never leave [0, 255] -> clamp is the identity.
    if dt == jnp.uint8:
        return x

    n = x.size
    itemsize = dt.itemsize
    # Packed sublane granularity: 8 rows (32-bit), 16 (16-bit), 32 (8-bit).
    packed = max(8, 32 // max(itemsize, 1))

    # Lane-dense flatten. Pad the flattened length to a multiple of 128 so the
    # lane axis is always 128-aligned (unmasked full-width stores); pad+slice
    # is a cheap fused epilogue, at most 127 extra elements.
    flat = x.reshape(-1)
    pad = (-n) % 128
    if pad:
        flat = jnp.pad(flat, (0, pad))
    n_padded = n + pad

    cols = 128
    for cand in (2048, 1024, 512, 256, 128):
        if n_padded % cand == 0:
            cols = cand
            break
    rows = n_padded // cols
    x2 = flat.reshape(rows, cols)

    block_bytes, vmem_limit, min_steps = _chip_config()
    row_bytes = cols * itemsize

    # Target row tile from the per-chip block-byte budget.
    tr_target = max(packed, (block_bytes // row_bytes) // packed * packed)
    # Cap for load balance: at least `min_steps` grid steps when big enough...
    tr_cap = _round_up(pl.cdiv(rows, min_steps), packed)
    # ...but never let that cap push blocks below ~2 MiB.
    tr_floor = max(packed, (_BLOCK_FLOOR_BYTES // row_bytes) // packed * packed)
    tr = min(tr_target, max(tr_cap, tr_floor))
    tr = min(tr, _round_up(rows, packed))

    grid = (pl.cdiv(rows, tr),)

    kwargs = {}
    if donate:
        # Footprint-only win (no bandwidth change); mirrors PyTorch inplace=True.
        kwargs["input_output_aliases"] = {0: 0}

    out2 = pl.pallas_call(
        _clipped_relu_kernel,
        out_shape=jax.ShapeDtypeStruct((rows, cols), x.dtype),
        grid_spec=pltpu.PrefetchScalarGridSpec(
            num_scalar_prefetch=0,
            grid=grid,
            in_specs=[pl.BlockSpec((tr, cols), lambda i: (i, 0))],
            out_specs=pl.BlockSpec((tr, cols), lambda i: (i, 0)),
        ),
        compiler_params=pltpu.CompilerParams(
            dimension_semantics=("parallel",),
            vmem_limit_bytes=vmem_limit,
        ),
        **kwargs,
    )(x2)

    out_flat = out2.reshape(-1)
    if pad:
        out_flat = out_flat[:n]
    return out_flat.reshape(orig_shape)


if __name__ == "__main__":
    key = jax.random.PRNGKey(0)
    # NCHW input, scaled so values span below 0 and above 255.
    x = jax.random.normal(key, (2, 4, 16, 16), dtype=jnp.float32) * 300.0

    out = jax.block_until_ready(clipped_relu(x))
    ref = jnp.clip(x, 0.0, 255.0)
    assert out.shape == x.shape
    assert out.dtype == x.dtype
    assert jnp.allclose(out, ref), "mismatch vs reference clamp (aligned path)"

    # Ragged element count (3*5*7*11 = 1155, not a multiple of 128) exercises
    # the 128-aligned pad + slice path.
    xr = jax.random.normal(jax.random.PRNGKey(1), (3, 5, 7, 11), dtype=jnp.float32) * 300.0
    outr = jax.block_until_ready(clipped_relu(xr))
    assert outr.shape == xr.shape
    assert jnp.allclose(outr, jnp.clip(xr, 0.0, 255.0)), "mismatch vs reference clamp (ragged path)"

    # uint8 fast path (identity).
    xu = jax.random.randint(jax.random.PRNGKey(2), (2, 4, 16, 16), 0, 256, dtype=jnp.int32).astype(jnp.uint8)
    outu = jax.block_until_ready(clipped_relu(xu))
    assert jnp.array_equal(outu, xu)

    print("KERNEL_OK")
</pallas_src>

<mosaic_0001>
module attributes {stable_mosaic.version = 11 : i64} {
  func.func @_clipped_relu_kernel(%arg0: i32, %arg1: memref<8x2048xf32, #tpu.memory_space<vmem>>, %arg2: memref<8x2048xf32, #tpu.memory_space<vmem>>) attributes {dimension_semantics = [#tpu.dimension_semantics<parallel>], iteration_bounds = array<i64: 1>, scalar_prefetch = 0 : i64, scratch_operands = 0 : i64, tpu.core_type = #tpu.core_type<tc>, window_params = [{transform_indices = @transform_0, window_bounds = array<i64: 8, 2048>}, {transform_indices = @transform_1, window_bounds = array<i64: 8, 2048>}]} {
    %c0 = arith.constant 0 : index
    %c0_0 = arith.constant 0 : index
    %0 = vector.load %arg1[%c0, %c0_0] : memref<8x2048xf32, #tpu.memory_space<vmem>>, vector<8x2048xf32>
    %cst = arith.constant 0.000000e+00 : f32
    %cst_1 = arith.constant 2.550000e+02 : f32
    %1 = vector.broadcast %cst : f32 to vector<8x2048xf32>
    %2 = arith.maximumf %1, %0 : vector<8x2048xf32>
    %3 = vector.broadcast %cst_1 : f32 to vector<8x2048xf32>
    %4 = arith.minimumf %3, %2 : vector<8x2048xf32>
    %c0_2 = arith.constant 0 : index
    %c0_3 = arith.constant 0 : index
    %5 = vector.load %arg2[%c0_2, %c0_3] : memref<8x2048xf32, #tpu.memory_space<vmem>>, vector<8x2048xf32>
    tpu.vector_store %arg2[%c0_2, %c0_3], %4 {strides = array<i32>} : memref<8x2048xf32, #tpu.memory_space<vmem>>, vector<8x2048xf32>,
    return
  }
  func.func @transform_0(%arg0: i32) -> (i32, i32) {
    %c0_i32 = arith.constant 0 : i32
    %c0_i32_0 = arith.constant 0 : i32
    return %arg0, %c0_i32 : i32, i32
  }
  func.func @transform_1(%arg0: i32) -> (i32, i32) {
    %c0_i32 = arith.constant 0 : i32
    %c0_i32_0 = arith.constant 0 : i32
    return %arg0, %c0_i32 : i32, i32
  }
}

</mosaic_0001>

<bundles_post_ra>
// kernel: tpu_custom_call.1
= control target key start
LH: loop header
LB: loop body
LE: loop exit
PB: predicated region body
PF: predicated region fallthrough
CT: control target
= control target key end

     0   :  { %6 = vsyncpa [#allocation3], 0  ;;  %s190_s0 = inlined_call_operand.hbm [shape: f32[1,2048], index: 0, kind: input, shape index: {}]   ;;  %s191_s1 = inlined_call_operand.hbm [shape: f32[1,2048], index: 1, kind: output, shape index: {}]  }
   0x1   :  { %7 = vsyncpa [#allocation4], 0 }
   0x2   :  { %11 = vsyncadd [#allocation3], 1792  ;;  %s12_s8 = sshll.u32 %s190_s0, 4  ;;  %s164_s9 = smov [#allocation2]   ;;  %s13_s8 = int_to_ptr.hbm [resolvable:$true] %s12_s8 }
   0x3   :  { %s14_s10 = sshll.u32 %s164_s9, 4  ;;  %s165_s11 = smov 256   ;;  %s15_s10 = int_to_ptr.vmem [resolvable:$true] %s14_s10 }
   0x4   :  { %s166_s12 = smov 16  }
   0x5   :  { %20 = dma.hbm_to_vmem [thread:$0]  %s13_s8, 256, %s15_s10, [#allocation3], %s165_s11, %s165_s11, %s166_s12  }
   0x6   :  { %160 = dma.done.wait [#allocation3], 2048  }
   0x7   :  { %161 = vsyncadd [#allocation3], 4294965248  ;;  %v25_v0 = vld [vmem:[#allocation2] sm:$0xff]  ;;  %v26_v1 = vld [vmem:[#allocation2 + $0x8] sm:$0xff] }
   0x8   :  { %v27_v2 = vld [vmem:[#allocation2 + $0x10] sm:$0xff]  ;;  %v41_v3 = vmax.f32 %v25_v0, 0.0  ;;  %v42_v4 = vmax.f32 %v26_v1, 0.0  ;;  %v28_v6 = vld [vmem:[#allocation2 + $0x18] sm:$0xff]  ;;  %v29_v7 = vld [vmem:[#allocation2 + $0x20] sm:$0xff] }
   0x9   :  { %v43_v5 = vmax.f32 %v27_v2, 0.0  ;;  %v30_v8 = vld [vmem:[#allocation2 + $0x28] sm:$0xff]  ;;  %v44_v9 = vmax.f32 %v28_v6, 0.0  ;;  %v45_v10 = vmax.f32 %v29_v7, 0.0  ;;  %v31_v12 = vld [vmem:[#allocation2 + $0x30] sm:$0xff]  ;;  %v32_v13 = vld [vmem:[#allocation2 + $0x38] sm:$0xff] }
   0xa   :  { %v46_v11 = vmax.f32 %v30_v8, 0.0  ;;  %v33_v14 = vld [vmem:[#allocation2 + $0x40] sm:$0xff]  ;;  %v57_v15 = vmin.f32 %v41_v3, 255.0  ;;  %v58_v16 = vmin.f32 %v42_v4, 255.0  ;;  %v47_v18 = vmax.f32 %v31_v12, 0.0  ;;  %v34_v19 = vld [vmem:[#allocation2 + $0x48] sm:$0xff] }
   0xb   :  { %v59_v17 = vmin.f32 %v43_v5, 255.0  ;;  %v60_v20 = vmin.f32 %v44_v9, 255.0  ;;  %v48_v21 = vmax.f32 %v32_v13, 0.0  ;;  %v35_v22 = vld [vmem:[#allocation2 + $0x50] sm:$0xff]  ;;  %v61_v23 = vmin.f32 %v45_v10, 255.0  ;;  %v36_v25 = vld [vmem:[#allocation2 + $0x58] sm:$0xff] }
   0xc   :  { %73 = vst [vmem:[#allocation5] sm:$0xff] %v57_v15  ;;  %v49_v24 = vmax.f32 %v33_v14, 0.0  ;;  %v62_v26 = vmin.f32 %v46_v11, 255.0  ;;  %v50_v27 = vmax.f32 %v34_v19, 0.0  ;;  %v37_v28 = vld [vmem:[#allocation2 + $0x60] sm:$0xff]  ;;  %v63_v29 = vmin.f32 %v47_v18, 255.0 }
   0xd   :  { %74 = vst [vmem:[#allocation5 + $0x8] sm:$0xff] %v58_v16  ;;  %v51_v30 = vmax.f32 %v35_v22, 0.0  ;;  %v38_v31 = vld [vmem:[#allocation2 + $0x68] sm:$0xff]  ;;  %v64_v32 = vmin.f32 %v48_v21, 255.0  ;;  %v52_v33 = vmax.f32 %v36_v25, 0.0  ;;  %v39_v34 = vld [vmem:[#allocation2 + $0x70] sm:$0xff] }
   0xe   :  { %75 = vst [vmem:[#allocation5 + $0x10] sm:$0xff] %v59_v17  ;;  %v65_v35 = vmin.f32 %v49_v24, 255.0  ;;  %v53_v36 = vmax.f32 %v37_v28, 0.0  ;;  %v40_v37 = vld [vmem:[#allocation2 + $0x78] sm:$0xff]  ;;  %v66_v38 = vmin.f32 %v50_v27, 255.0  ;;  %v54_v39 = vmax.f32 %v38_v31, 0.0 }
   0xf   :  { %76 = vst [vmem:[#allocation5 + $0x18] sm:$0xff] %v60_v20  ;;  %v67_v40 = vmin.f32 %v51_v30, 255.0  ;;  %v55_v41 = vmax.f32 %v39_v34, 0.0  ;;  %v68_v42 = vmin.f32 %v52_v33, 255.0  ;;  %v56_v43 = vmax.f32 %v40_v37, 0.0 }
  0x10   :  { %77 = vst [vmem:[#allocation5 + $0x20] sm:$0xff] %v61_v23  ;;  %v69_v44 = vmin.f32 %v53_v36, 255.0  ;;  %v70_v45 = vmin.f32 %v54_v39, 255.0 }
  0x11   :  { %78 = vst [vmem:[#allocation5 + $0x28] sm:$0xff] %v62_v26  ;;  %v71_v46 = vmin.f32 %v55_v41, 255.0  ;;  %v72_v47 = vmin.f32 %v56_v43, 255.0 }
  0x12   :  { %79 = vst [vmem:[#allocation5 + $0x30] sm:$0xff] %v63_v29 }
  0x13   :  { %80 = vst [vmem:[#allocation5 + $0x38] sm:$0xff] %v64_v32 }
  0x14   :  { %81 = vst [vmem:[#allocation5 + $0x40] sm:$0xff] %v65_v35 }
  0x15   :  { %82 = vst [vmem:[#allocation5 + $0x48] sm:$0xff] %v66_v38 }
  0x16   :  { %83 = vst [vmem:[#allocation5 + $0x50] sm:$0xff] %v67_v40 }
  0x17   :  { %84 = vst [vmem:[#allocation5 + $0x58] sm:$0xff] %v68_v42 }
  0x18   :  { %85 = vst [vmem:[#allocation5 + $0x60] sm:$0xff] %v69_v44 }
  0x19   :  { %86 = vst [vmem:[#allocation5 + $0x68] sm:$0xff] %v70_v45 }
  0x1a   :  { %87 = vst [vmem:[#allocation5 + $0x70] sm:$0xff] %v71_v46 }
  0x1b   :  { %88 = vst [vmem:[#allocation5 + $0x78] sm:$0xff] %v72_v47 }
  0x1c   :  { %92 = vsyncadd [#allocation4], 1792  ;;  %s95_s14 = sshll.u32 %s191_s1, 4  ;;  %s167_s15 = smov [#allocation5]   ;;  %s96_s14 = int_to_ptr.hbm [resolvable:$true] %s95_s14 }
  0x1d   :  { %s93_s16 = sshll.u32 %s167_s15, 4  ;;  %s94_s16 = int_to_ptr.vmem [resolvable:$true] %s93_s16 }
  0x1e   :  { %101 = dma.vmem_to_hbm [thread:$0]  %s94_s16, 256, %s96_s14, [#allocation4], %s165_s11, %s165_s11, %s166_s12  }
  0x1f   :  { %162 = dma.done.wait [#allocation4], 2048  }
  0x20   :  { %163 = vsyncadd [#allocation4], 4294965248 }
  0x21   :  { %106 = vsyncpa [#allocation3], 1 }
  0x22   :  { %107 = vsyncpa [#allocation4], 1 }

</bundles_post_ra>
